<compile_context>
chip_gen: v7x
topology: tpu7x:2x2x1
jax: 0.10.0
libtpu: 0.0.40
codegen_flags: <defaults>
</compile_context>

<pallas_src>
import jax
import jax.numpy as jnp
from jax.experimental import pallas as pl
from jax.experimental.pallas import tpu as pltpu

H1 = 512
H2 = 128


def _round_up(n: int, m: int) -> int:
    return (n + m - 1) // m * m


def _mlp_kernel(x_ref, w1_ref, b1_ref, w2_ref, b2_ref, w3_ref, b3_ref, out_ref):
    # x tile: [TB, D] f32 (pipelined); cast to bf16 in-kernel for the MXU.
    x = x_ref[...].astype(jnp.bfloat16)

    # fc1 + ReLU  — bf16 x bf16 on the MXU, f32 accumulation.
    h1 = jnp.dot(x, w1_ref[...], preferred_element_type=jnp.float32) + b1_ref[...]
    h1 = jnp.maximum(h1, 0.0)                       # [TB, 512] f32

    # fc2 + ReLU  — cast the activation back to bf16 for full MXU rate.
    h2 = jnp.dot(h1.astype(jnp.bfloat16), w2_ref[...],
                 preferred_element_type=jnp.float32) + b2_ref[...]
    h2 = jnp.maximum(h2, 0.0)                       # [TB, 128] f32

    # fc3 (N=1) on the VPU/XLU instead of a lane-sparse MXU matmul:
    # elementwise multiply by the [1,128] weight row + cross-lane reduce.
    logits = jnp.sum(h2 * w3_ref[...], axis=-1, keepdims=True) + b3_ref[...]

    out_ref[...] = jax.nn.sigmoid(logits)           # [TB, 1] f32


def _choose_tile(B: int, block_b: int):
    """Pick the batch tile size, padded batch, and number of grid steps."""
    block_b = max(16, _round_up(block_b, 16))       # enforce sublane packing
    b16 = _round_up(B, 16)
    if b16 <= block_b:
        # Whole batch fits in one tile: split into >=2 grid steps so the
        # "parallel" grid axis can use both TensorCores on v7x.
        tb = max(16, _round_up(pl.cdiv(b16, 2), 16))
    else:
        tb = block_b
    b_pad = _round_up(B, tb)
    num_tiles = b_pad // tb
    return tb, b_pad, num_tiles


def net_forward(x, params, *, block_b: int = 4096):
    """Forward pass of `Net`. x: [B, D] float32 -> [B] float32 (sigmoid scores)."""
    w1, b1, w2, b2, w3, b3 = params
    B, D = x.shape

    tb, b_pad, num_tiles = _choose_tile(B, block_b)

    x_p = x
    if b_pad != B:
        # Zero rows -> finite junk scores, sliced off below.
        x_p = jnp.pad(x_p, ((0, b_pad - B), (0, 0)))

    flops = 2 * b_pad * (D * H1 + H1 * H2 + H2)
    bytes_accessed = (
        x_p.size * 4                      # f32 activations in (cast done in-kernel)
        + w1.size * 2 + w2.size * 2       # bf16 weights
        + (b1.size + b2.size + w3.size + b3.size) * 4
        + b_pad * 4                       # f32 scores out
    )

    cp_kwargs = dict(dimension_semantics=("parallel",))   # megacore on v7x
    if tb >= 2048:
        # Large tiles exceed v5e's ~16 MiB default scoped VMEM; 48 MiB fits
        # all generations (v7x physical is 64 MiB per TC).
        cp_kwargs["vmem_limit_bytes"] = 48 * 1024 * 1024

    out = pl.pallas_call(
        _mlp_kernel,
        out_shape=jax.ShapeDtypeStruct((b_pad, 1), jnp.float32),
        grid_spec=pltpu.PrefetchScalarGridSpec(
            num_scalar_prefetch=0,
            grid=(num_tiles,),
            in_specs=[
                pl.BlockSpec((tb, D), lambda i: (i, 0)),     # x tile (pipelined, f32)
                pl.BlockSpec((D, H1), lambda i: (0, 0)),     # w1 (resident, bf16)
                pl.BlockSpec((1, H1), lambda i: (0, 0)),     # b1
                pl.BlockSpec((H1, H2), lambda i: (0, 0)),    # w2 (resident, bf16)
                pl.BlockSpec((1, H2), lambda i: (0, 0)),     # b2
                pl.BlockSpec((1, H2), lambda i: (0, 0)),     # w3 row
                pl.BlockSpec((1, 1), lambda i: (0, 0)),      # b3
            ],
            out_specs=pl.BlockSpec((tb, 1), lambda i: (i, 0)),
        ),
        compiler_params=pltpu.CompilerParams(**cp_kwargs),
        cost_estimate=pl.CostEstimate(
            flops=flops,
            transcendentals=2 * b_pad,        # exp + reciprocal per row (advisory)
            bytes_accessed=bytes_accessed,
        ),
    )(x_p, w1, b1, w2, b2, w3, b3)

    # torch's .squeeze() on [B, 1] -> [B]; drop padded rows.
    return out[:B, 0]


def init_params(total_emb_dim: int, key):
    """Deterministic init mimicking nn.Linear default (uniform +/- 1/sqrt(fan_in)).
    fc1/fc2 weights stored [in, out] in bf16; biases f32; fc3 weight kept as the
    PyTorch-shaped [1, 128] f32 row, fc3 bias as [1, 1] f32."""
    dims = [(total_emb_dim, H1), (H1, H2), (H2, 1)]
    raw = []
    for fan_in, fan_out in dims:
        key, kw, kb = jax.random.split(key, 3)
        bound = 1.0 / jnp.sqrt(jnp.float32(fan_in))
        w = jax.random.uniform(kw, (fan_in, fan_out), jnp.float32, -bound, bound)
        b = jax.random.uniform(kb, (1, fan_out), jnp.float32, -bound, bound)
        raw += [w, b]
    w1, b1, w2, b2, w3, b3 = raw
    return (
        w1.astype(jnp.bfloat16), b1,
        w2.astype(jnp.bfloat16), b2,
        w3.T,                    # [1, 128] f32 row (== PyTorch fc3.weight layout)
        b3,                      # [1, 1] f32
    )


def net_forward_ref(x, params):
    """Pure-JAX reference mirroring the kernel's precision choices."""
    w1, b1, w2, b2, w3, b3 = params
    xb = x.astype(jnp.bfloat16)
    h1 = jnp.maximum(jnp.dot(xb, w1, preferred_element_type=jnp.float32) + b1, 0.0)
    h2 = jnp.maximum(
        jnp.dot(h1.astype(jnp.bfloat16), w2, preferred_element_type=jnp.float32) + b2,
        0.0)
    logits = jnp.sum(h2 * w3, axis=-1, keepdims=True) + b3
    return jnp.squeeze(jax.nn.sigmoid(logits), axis=-1)


if __name__ == "__main__":
    key = jax.random.PRNGKey(0)
    kx, kp, kx2 = jax.random.split(key, 3)

    total_emb_dim = 32
    params = init_params(total_emb_dim, kp)

    # Case 1: small batch (padded 8 -> 16, single grid step).
    batch = 8
    x = jax.random.normal(kx, (batch, total_emb_dim), jnp.float32)
    out = net_forward(x, params)
    jax.block_until_ready(out)
    ref = net_forward_ref(x, params)
    assert out.shape == (batch,), out.shape
    assert jnp.allclose(out, ref, atol=1e-3), float(jnp.max(jnp.abs(out - ref)))

    # Case 2: default tile -> batch split into 2 grid steps (megacore path).
    batch2 = 300
    x2 = jax.random.normal(kx2, (batch2, total_emb_dim), jnp.float32)
    out2 = net_forward(x2, params)                 # tb=160, grid=(2,), padded to 320
    jax.block_until_ready(out2)
    ref2 = net_forward_ref(x2, params)
    assert out2.shape == (batch2,), out2.shape
    assert jnp.allclose(out2, ref2, atol=1e-3), float(jnp.max(jnp.abs(out2 - ref2)))

    # Case 3: explicit small tile -> 3-step grid (exercises multi-tile pipelining
    # with resident weights and tail padding).
    out3 = net_forward(x2, params, block_b=128)    # tb=128, grid=(3,), padded to 384
    jax.block_until_ready(out3)
    assert out3.shape == (batch2,), out3.shape
    assert jnp.allclose(out3, ref2, atol=1e-3), float(jnp.max(jnp.abs(out3 - ref2)))

    print("KERNEL_OK")
</pallas_src>

<mosaic_0001>
module attributes {stable_mosaic.version = 11 : i64} {
  func.func @_mlp_kernel(%arg0: i32, %arg1: memref<16x32xf32, #tpu.memory_space<vmem>>, %arg2: memref<32x512xbf16, #tpu.memory_space<vmem>>, %arg3: memref<1x512xf32, #tpu.memory_space<vmem>>, %arg4: memref<512x128xbf16, #tpu.memory_space<vmem>>, %arg5: memref<1x128xf32, #tpu.memory_space<vmem>>, %arg6: memref<1x128xf32, #tpu.memory_space<vmem>>, %arg7: memref<1x1xf32, #tpu.memory_space<vmem>>, %arg8: memref<16x1xf32, #tpu.memory_space<vmem>>) attributes {dimension_semantics = [#tpu.dimension_semantics<parallel>], iteration_bounds = array<i64: 1>, scalar_prefetch = 0 : i64, scratch_operands = 0 : i64, tpu.core_type = #tpu.core_type<tc>, window_params = [{transform_indices = @transform_0, window_bounds = array<i64: 16, 32>}, {pipeline_mode = #tpu.pipeline_mode<synchronous>, transform_indices = @transform_1, window_bounds = array<i64: 32, 512>}, {pipeline_mode = #tpu.pipeline_mode<synchronous>, transform_indices = @transform_2, window_bounds = array<i64: 1, 512>}, {pipeline_mode = #tpu.pipeline_mode<synchronous>, transform_indices = @transform_3, window_bounds = array<i64: 512, 128>}, {pipeline_mode = #tpu.pipeline_mode<synchronous>, transform_indices = @transform_4, window_bounds = array<i64: 1, 128>}, {pipeline_mode = #tpu.pipeline_mode<synchronous>, transform_indices = @transform_5, window_bounds = array<i64: 1, 128>}, {pipeline_mode = #tpu.pipeline_mode<synchronous>, transform_indices = @transform_6, window_bounds = array<i64: 1, 1>}, {transform_indices = @transform_7, window_bounds = array<i64: 16, 1>}]} {
    %c0 = arith.constant 0 : index
    %c0_0 = arith.constant 0 : index
    %0 = vector.load %arg1[%c0, %c0_0] : memref<16x32xf32, #tpu.memory_space<vmem>>, vector<16x32xf32>
    %1 = arith.truncf %0 : vector<16x32xf32> to vector<16x32xbf16>
    %c0_1 = arith.constant 0 : index
    %c0_2 = arith.constant 0 : index
    %2 = vector.load %arg2[%c0_1, %c0_2] : memref<32x512xbf16, #tpu.memory_space<vmem>>, vector<32x512xbf16>
    %cst = arith.constant dense<0.000000e+00> : vector<16x512xf32>
    %3 = tpu.matmul %1, %2, %cst {dimension_numbers = #tpu.dot_dimension_numbers<[1], [0], [0], [1], [0, 0, 1, 1], [], []>} : vector<16x32xbf16>, vector<32x512xbf16>, vector<16x512xf32> -> vector<16x512xf32>
    %c0_3 = arith.constant 0 : index
    %c0_4 = arith.constant 0 : index
    %4 = vector.load %arg3[%c0_3, %c0_4] : memref<1x512xf32, #tpu.memory_space<vmem>>, vector<1x512xf32>
    %5 = vector.broadcast %4 : vector<1x512xf32> to vector<16x512xf32>
    %6 = arith.addf %3, %5 : vector<16x512xf32>
    %cst_5 = arith.constant 0.000000e+00 : f32
    %7 = vector.broadcast %cst_5 : f32 to vector<16x512xf32>
    %8 = arith.maximumf %6, %7 : vector<16x512xf32>
    %9 = arith.truncf %8 : vector<16x512xf32> to vector<16x512xbf16>
    %c0_6 = arith.constant 0 : index
    %c0_7 = arith.constant 0 : index
    %10 = vector.load %arg4[%c0_6, %c0_7] : memref<512x128xbf16, #tpu.memory_space<vmem>>, vector<512x128xbf16>
    %cst_8 = arith.constant dense<0.000000e+00> : vector<16x128xf32>
    %11 = tpu.matmul %9, %10, %cst_8 {dimension_numbers = #tpu.dot_dimension_numbers<[1], [0], [0], [1], [0, 0, 1, 1], [], []>} : vector<16x512xbf16>, vector<512x128xbf16>, vector<16x128xf32> -> vector<16x128xf32>
    %c0_9 = arith.constant 0 : index
    %c0_10 = arith.constant 0 : index
    %12 = vector.load %arg5[%c0_9, %c0_10] : memref<1x128xf32, #tpu.memory_space<vmem>>, vector<1x128xf32>
    %13 = vector.broadcast %12 : vector<1x128xf32> to vector<16x128xf32>
    %14 = arith.addf %11, %13 : vector<16x128xf32>
    %cst_11 = arith.constant 0.000000e+00 : f32
    %15 = vector.broadcast %cst_11 : f32 to vector<16x128xf32>
    %16 = arith.maximumf %14, %15 : vector<16x128xf32>
    %c0_12 = arith.constant 0 : index
    %c0_13 = arith.constant 0 : index
    %17 = vector.load %arg6[%c0_12, %c0_13] : memref<1x128xf32, #tpu.memory_space<vmem>>, vector<1x128xf32>
    %18 = vector.broadcast %17 : vector<1x128xf32> to vector<16x128xf32>
    %19 = arith.mulf %16, %18 : vector<16x128xf32>
    %cst_14 = arith.constant dense<0.000000e+00> : vector<16xf32>
    %20 = vector.multi_reduction <add>, %19, %cst_14 [1] : vector<16x128xf32> to vector<16xf32>
    %21 = vector.shape_cast %20 : vector<16xf32> to vector<16x1xf32>
    %c0_15 = arith.constant 0 : index
    %c0_16 = arith.constant 0 : index
    %22 = vector.load %arg7[%c0_15, %c0_16] : memref<1x1xf32, #tpu.memory_space<vmem>>, vector<1x1xf32>
    %23 = vector.broadcast %22 : vector<1x1xf32> to vector<16x1xf32>
    %24 = arith.addf %21, %23 : vector<16x1xf32>
    %25 = arith.negf %24 : vector<16x1xf32>
    %26 = math.exp %25 : vector<16x1xf32>
    %cst_17 = arith.constant 1.000000e+00 : f32
    %27 = vector.broadcast %cst_17 : f32 to vector<16x1xf32>
    %28 = arith.addf %27, %26 : vector<16x1xf32>
    %29 = arith.divf %27, %28 : vector<16x1xf32>
    %c0_18 = arith.constant 0 : index
    %c0_19 = arith.constant 0 : index
    %30 = vector.load %arg8[%c0_18, %c0_19] : memref<16x1xf32, #tpu.memory_space<vmem>>, vector<16x1xf32>
    tpu.vector_store %arg8[%c0_18, %c0_19], %29 {strides = array<i32>} : memref<16x1xf32, #tpu.memory_space<vmem>>, vector<16x1xf32>,
    return
  }
  func.func @transform_0(%arg0: i32) -> (i32, i32) {
    %c0_i32 = arith.constant 0 : i32
    %c0_i32_0 = arith.constant 0 : i32
    return %arg0, %c0_i32 : i32, i32
  }
  func.func @transform_1(%arg0: i32) -> (i32, i32) {
    %c0_i32 = arith.constant 0 : i32
    %c0_i32_0 = arith.constant 0 : i32
    %c0_i32_1 = arith.constant 0 : i32
    return %c0_i32, %c0_i32_0 : i32, i32
  }
  func.func @transform_2(%arg0: i32) -> (i32, i32) {
    %c0_i32 = arith.constant 0 : i32
    %c0_i32_0 = arith.constant 0 : i32
    %c0_i32_1 = arith.constant 0 : i32
    return %c0_i32, %c0_i32_0 : i32, i32
  }
  func.func @transform_3(%arg0: i32) -> (i32, i32) {
    %c0_i32 = arith.constant 0 : i32
    %c0_i32_0 = arith.constant 0 : i32
    %c0_i32_1 = arith.constant 0 : i32
    return %c0_i32, %c0_i32_0 : i32, i32
  }
  func.func @transform_4(%arg0: i32) -> (i32, i32) {
    %c0_i32 = arith.constant 0 : i32
    %c0_i32_0 = arith.constant 0 : i32
    %c0_i32_1 = arith.constant 0 : i32
    return %c0_i32, %c0_i32_0 : i32, i32
  }
  func.func @transform_5(%arg0: i32) -> (i32, i32) {
    %c0_i32 = arith.constant 0 : i32
    %c0_i32_0 = arith.constant 0 : i32
    %c0_i32_1 = arith.constant 0 : i32
    return %c0_i32, %c0_i32_0 : i32, i32
  }
  func.func @transform_6(%arg0: i32) -> (i32, i32) {
    %c0_i32 = arith.constant 0 : i32
    %c0_i32_0 = arith.constant 0 : i32
    %c0_i32_1 = arith.constant 0 : i32
    return %c0_i32, %c0_i32_0 : i32, i32
  }
  func.func @transform_7(%arg0: i32) -> (i32, i32) {
    %c0_i32 = arith.constant 0 : i32
    %c0_i32_0 = arith.constant 0 : i32
    return %arg0, %c0_i32 : i32, i32
  }
}

</mosaic_0001>

<bundles_post_ra>
// kernel: tpu_custom_call.1
= control target key start
LH: loop header
LB: loop body
LE: loop exit
PB: predicated region body
PF: predicated region fallthrough
CT: control target
= control target key end

     0   :  { %s962_s0 = inlined_call_operand.hbm [shape: f32[16,32], index: 0, kind: input, shape index: {}]   ;;  %s963_s1 = inlined_call_operand.hbm [shape: bf16[32,512], index: 1, kind: input, shape index: {}]   ;;  %s964_s2 = inlined_call_operand.vmem [shape: f32[1,512], index: 2, kind: input, shape index: {}]   ;;  %s965_s3 = inlined_call_operand.hbm [shape: bf16[512,128], index: 3, kind: input, shape index: {}]   ;;  %s966_s4 = inlined_call_operand.vmem [shape: f32[1,128], index: 4, kind: input, shape index: {}]   ;;  %s967_s5 = inlined_call_operand.vmem [shape: f32[1,128], index: 5, kind: input, shape index: {}]   ;;  %s968_s6 = inlined_call_operand.<no memory space> [shape: f32[1,1], index: 6, kind: input, shape index: {}]   ;;  %s969_s7 = inlined_call_operand.vmem [shape: f32[16,1], index: 7, kind: output, shape index: {}]  }
   0x1   :  { %v12_v0 = vstv %s968_s6 }
   0x2   :  { %13 = vst [vmem:[#allocation2] sm:$0x1] %v12_v0 }
   0x3   :  { %14 = vsyncpa [#allocation4], 0 }
   0x4   :  { %15 = vsyncpa [#allocation6], 0  ;;  %s858_s26 = smov [#allocation5]   ;;  %s788_s30 = scalar_lea.hbm %s963_s1, 1024 }
   0x5   :  { %s33_s27 = sshll.u32 %s858_s26, 4  ;;  %p789_p0 = scmp.ne.s32.totalorder %s963_s1, %s788_s30  ;;  %s34_s27 = int_to_ptr.vmem [resolvable:$true] %s33_s27 }
   0x6   :  { %p792_p1 = scmp.lt.u32.totalorder %s788_s30, %s963_s1 }
   0x8   :  { %p794_p2 = pnand %p792_p1, %p789_p0 }
   0xa   :  { %797 = shalt.err (!%p794_p2)
}
   0xb   :  { %s798_s6 = scalar_lea.vmem %s34_s27, 1024  ;;  %p803_p4 = scmp.lt.s32.totalorder %s34_s27, %s34_s27 }
   0xc   :  { %p799_p3 = scmp.ne.s32.totalorder %s34_s27, %s798_s6  ;;  %p804_p5 = scmp.lt.s32.totalorder %s798_s6, %s798_s6 }
   0xe   :  { %p805_p6 = por %p804_p5, %p803_p4 }
  0x10   :  { %p806_p7 = pnand %p805_p6, %p799_p3 }
  0x12   :  { %809 = shalt.err (!%p806_p7)
}
  0x13   :  { %s859_s12 = smov 256   ;;  %s860_s13 = smov 16  }
  0x14   :  { %39 = dma.hbm_to_vmem [thread:$0]  %s963_s1, 1024, %s34_s27, [#allocation6], %s859_s12, %s859_s12, %s860_s13  }
  0x15   :  { %s861_s16 = smov [#allocation3]   ;;  %s810_s20 = scalar_lea.hbm %s962_s0, 256 }
  0x16   :  { %s21_s17 = sshll.u32 %s861_s16, 4  ;;  %p811_p8 = scmp.ne.s32.totalorder %s962_s0, %s810_s20  ;;  %s22_s17 = int_to_ptr.vmem [resolvable:$true] %s21_s17 }
  0x17   :  { %p814_p9 = scmp.lt.u32.totalorder %s810_s20, %s962_s0 }
  0x19   :  { %p816_p10 = pnand %p814_p9, %p811_p8 }
  0x1b   :  { %819 = shalt.err (!%p816_p10)
}
  0x1c   :  { %s820_s25 = scalar_lea.vmem %s22_s17, 256  ;;  %p825_p12 = scmp.lt.s32.totalorder %s22_s17, %s22_s17 }
  0x1d   :  { %p821_p11 = scmp.ne.s32.totalorder %s22_s17, %s820_s25  ;;  %p826_p13 = scmp.lt.s32.totalorder %s820_s25, %s820_s25 }
  0x1f   :  { %p827_p0 = por %p826_p13, %p825_p12 }
  0x21   :  { %p828_p1 = pnand %p827_p0, %p821_p11 }
  0x23   :  { %831 = shalt.err (!%p828_p1)
}
  0x24   :  { %s862_s1 = smov 128   ;;  %s863_s26 = smov 8  }
  0x25   :  { %27 = dma.hbm_to_vmem [thread:$0]  %s962_s0, 256, %s22_s17, [#allocation4], %s862_s1, %s862_s1, %s863_s26  }
  0x26   :  { %s864_s29 = smov [#allocation7]   ;;  %s832_s10 = scalar_lea.hbm %s965_s3, 4096 }
  0x27   :  { %s47_s30 = sshll.u32 %s864_s29, 4  ;;  %p833_p2 = scmp.ne.s32.totalorder %s965_s3, %s832_s10  ;;  %s48_s30 = int_to_ptr.vmem [resolvable:$true] %s47_s30 }
  0x28   :  { %p836_p3 = scmp.lt.u32.totalorder %s832_s10, %s965_s3 }
  0x2a   :  { %p838_p4 = pnand %p836_p3, %p833_p2 }
  0x2c   :  { %841 = shalt.err (!%p838_p4)
}
  0x2d   :  { %s842_s14 = scalar_lea.vmem %s48_s30, 4096  ;;  %p847_p6 = scmp.lt.s32.totalorder %s48_s30, %s48_s30 }
  0x2e   :  { %p843_p5 = scmp.ne.s32.totalorder %s48_s30, %s842_s14  ;;  %p848_p7 = scmp.lt.s32.totalorder %s842_s14, %s842_s14 }
  0x30   :  { %p849_p8 = por %p848_p7, %p847_p6 }
  0x32   :  { %p850_p9 = pnand %p849_p8, %p843_p5 }
  0x34   :  { %853 = shalt.err (!%p850_p9)
}
  0x35   :  { %s865_s0 = smov 64   ;;  %s866_s15 = smov 4  }
  0x36   :  { %53 = dma.hbm_to_vmem [thread:$0]  %s965_s3, 4096, %s48_s30, [#allocation6], %s865_s0, %s865_s0, %s866_s15  }
  0x37   :  { %854 = dma.done.wait [#allocation4], 256  }
  0x38   :  { %855 = vsyncadd [#allocation4], 4294967040 }
  0x39   :  { %856 = dma.done.wait [#allocation6], 5120  }
  0x3a   :  { %857 = vsyncadd [#allocation6], 4294962176  ;;  %v867_v1 = vmov 0   ;;  %v736_v2 = vld [vmem:[#allocation5 + $0x4] ss:$16 sps:$4 sm:$0xff]   ;;  %v71_v11 = vld [vmem:[#allocation3 + $0x8] sm:$0xff]  ;;  %v83_v45 = vlaneseq }
  0x3b   :  { %179 = vmatprep.mubr.bf16.mxu0 %v867_v1  ;;  %222 = vmatprep.mubr.bf16.mxu1 %v867_v1  ;;  %v738_v3 = vld [vmem:[#allocation5 + $0xc] ss:$16 sps:$4 sm:$0xff]   ;;  %v740_v4 = vld [vmem:[#allocation5] ss:$16 sps:$4 sm:$0xff]   ;;  %v741_v5 = vld [vmem:[#allocation5 + $0x8] ss:$16 sps:$4 sm:$0xff]  }
  0x3c   :  { %147 = vmatprep.subr.bf16.mxu0 %v736_v2  ;;  %190 = vmatprep.subr.bf16.mxu1 %v738_v3  ;;  %v742_v6 = vld [vmem:[#allocation5 + $0x24] ss:$16 sps:$4 sm:$0xff]   ;;  %v744_v7 = vld [vmem:[#allocation5 + $0x2c] ss:$16 sps:$4 sm:$0xff]   ;;  %v746_v8 = vld [vmem:[#allocation5 + $0x20] ss:$16 sps:$4 sm:$0xff]  }
  0x3d   :  { %148 = vmatpush1.bf16.msra.mxu0 %v740_v4  ;;  %191 = vmatpush1.bf16.msra.mxu1 %v741_v5  ;;  %v747_v9 = vld [vmem:[#allocation5 + $0x28] ss:$16 sps:$4 sm:$0xff]   ;;  %v70_v10 = vld [vmem:[#allocation3] sm:$0xff]  ;;  %v748_v12 = vld [vmem:[#allocation7 + $0x40] sm:$0xff]   ;;  %vm143_vm0 = vcmask 261120   ;;  %v84_v46 = vshrl.u32 %v83_v45, 7 }
  0x3e   :  { %149 = vmatprep.subr.bf16.mxu0 %v742_v6  ;;  %192 = vmatprep.subr.bf16.mxu1 %v744_v7  ;;  %v72_v13 = vpack.c.bf16 %v71_v11, %v70_v10  ;;  %v749_v14 = vld [vmem:[#allocation7 + $0xc0] sm:$0xff]   ;;  %v752_v17 = vld [vmem:[#allocation7 + $0x48] sm:$0xff]   ;;  %v756_v21 = vld [vmem:[#allocation7 + $0x50] sm:$0xff]   ;;  %vm626_vm1 = vcmask 7168  }
  0x3f   :  { %v750_v15 = vld [vmem:[#allocation7] sm:$0xff]   ;;  %v753_v18 = vld [vmem:[#allocation7 + $0xc8] sm:$0xff]   ;;  %v757_v22 = vld [vmem:[#allocation7 + $0xd0] sm:$0xff]   ;;  %v85_v47 = vsub.s32 0, %v84_v46  ;;  %v93_v48 = vsub.s32 2, %v84_v46  ;;  %v89_v50 = vsub.s32 1, %v84_v46 }
  0x40   :  { %v751_v16 = vld [vmem:[#allocation7 + $0x80] sm:$0xff]   ;;  %v754_v19 = vld [vmem:[#allocation7 + $0x8] sm:$0xff]   ;;  %v758_v23 = vld [vmem:[#allocation7 + $0x10] sm:$0xff]   ;;  %v97_v51 = vsub.s32 3, %v84_v46 }
  0x41   :  { %150 = vmatpush1.bf16.msra.mxu0 %v746_v8  ;;  %193 = vmatpush1.bf16.msra.mxu1 %v747_v9  ;;  %v755_v20 = vld [vmem:[#allocation7 + $0x88] sm:$0xff]   ;;  %v759_v24 = vld [vmem:[#allocation7 + $0x90] sm:$0xff]   ;;  %v760_v25 = vld [vmem:[#allocation7 + $0x58] sm:$0xff]  }
  0x42   :  { %682 = vmatprep.subr.bf16.mxu0 %v748_v12  ;;  %704 = vmatprep.subr.bf16.mxu1 %v749_v14  ;;  %v761_v26 = vld [vmem:[#allocation7 + $0xd8] sm:$0xff]   ;;  %v764_v29 = vld [vmem:[#allocation7 + $0x60] sm:$0xff]   ;;  %v768_v33 = vld [vmem:[#allocation7 + $0x68] sm:$0xff]  }
  0x43   :  { %v762_v27 = vld [vmem:[#allocation7 + $0x18] sm:$0xff]   ;;  %v765_v30 = vld [vmem:[#allocation7 + $0xe0] sm:$0xff]   ;;  %v769_v34 = vld [vmem:[#allocation7 + $0xe8] sm:$0xff]  }
  0x44   :  { %643 = vmatmul.mubr.msk.bf16.vlgmr.msra.gmra.mrb[0].mxu0 %vm143_vm0, %v72_v13  ;;  %644 = vmatmul.mubr.msk.bf16.vlgmr.msra.gmra.mrb[0].mxu1 %vm143_vm0, %v72_v13  ;;  %v763_v28 = vld [vmem:[#allocation7 + $0x98] sm:$0xff]   ;;  %v766_v31 = vld [vmem:[#allocation7 + $0x20] sm:$0xff]   ;;  %v770_v35 = vld [vmem:[#allocation7 + $0x28] sm:$0xff]  }
  0x45   :  { %683 = vmatpush3.bf16.msra.mxu0 %v750_v15  ;;  %705 = vmatpush3.bf16.msra.mxu1 %v751_v16  ;;  %v767_v32 = vld [vmem:[#allocation7 + $0xa0] sm:$0xff]   ;;  %v771_v36 = vld [vmem:[#allocation7 + $0xa8] sm:$0xff]   ;;  %v772_v37 = vld [vmem:[#allocation7 + $0x70] sm:$0xff]  }
  0x46   :  { %684 = vmatprep.subr.bf16.mxu0 %v752_v17  ;;  %706 = vmatprep.subr.bf16.mxu1 %v753_v18  ;;  %v773_v38 = vld [vmem:[#allocation7 + $0xf0] sm:$0xff]   ;;  %v776_v41 = vld [vmem:[#allocation7 + $0x78] sm:$0xff]  }
  0x47   :  { %v774_v39 = vld [vmem:[#allocation7 + $0x30] sm:$0xff]   ;;  %v777_v42 = vld [vmem:[#allocation7 + $0xf8] sm:$0xff]  }
  0x48   :  { %v775_v40 = vld [vmem:[#allocation7 + $0xb0] sm:$0xff]   ;;  %v778_v43 = vld [vmem:[#allocation7 + $0x38] sm:$0xff]  }
  0x49   :  { %685 = vmatpush3.bf16.msra.mxu0 %v754_v19  ;;  %707 = vmatpush3.bf16.msra.mxu1 %v755_v20  ;;  %v779_v44 = vld [vmem:[#allocation7 + $0xb8] sm:$0xff]   ;;  %v81_v49 = vld [vmem:[%s964_s2] sm:$0xf] }
  0x4a   :  { %686 = vmatprep.subr.bf16.mxu0 %v756_v21  ;;  %708 = vmatprep.subr.bf16.mxu1 %v757_v22  ;;  %v86_v52 = vrot.slane %v81_v49, %v85_v47  ;;  %v94_v53 = vrot.slane %v81_v49, %v93_v48  ;;  %v90_v54 = vrot.slane %v81_v49, %v89_v50  ;;  %v645_v22 = vld [vmem:[%s966_s4] ss:$0 sm:$0xff] }
  0x4b   :  { %v98_v55 = vrot.slane %v81_v49, %v97_v51 }
  0x4d   :  { %687 = vmatpush3.bf16.msra.mxu0 %v758_v23  ;;  %709 = vmatpush3.bf16.msra.mxu1 %v759_v24 }
  0x4e   :  { %688 = vmatprep.subr.bf16.mxu0 %v760_v25  ;;  %710 = vmatprep.subr.bf16.mxu1 %v761_v26 }
  0x51   :  { %689 = vmatpush3.bf16.msra.mxu0 %v762_v27  ;;  %711 = vmatpush3.bf16.msra.mxu1 %v763_v28 }
  0x52   :  { %690 = vmatprep.subr.bf16.mxu0 %v764_v29  ;;  %712 = vmatprep.subr.bf16.mxu1 %v765_v30 }
  0x55   :  { %691 = vmatpush3.bf16.msra.mxu0 %v766_v31  ;;  %713 = vmatpush3.bf16.msra.mxu1 %v767_v32 }
  0x56   :  { %692 = vmatprep.subr.bf16.mxu0 %v768_v33  ;;  %714 = vmatprep.subr.bf16.mxu1 %v769_v34 }
  0x59   :  { %693 = vmatpush3.bf16.msra.mxu0 %v770_v35  ;;  %715 = vmatpush3.bf16.msra.mxu1 %v771_v36  ;;  %v678_v36 = vld [vmem:[%s967_s5] ss:$0 sm:$0xff] }
  0x5a   :  { %694 = vmatprep.subr.bf16.mxu0 %v772_v37  ;;  %716 = vmatprep.subr.bf16.mxu1 %v773_v38 }
  0x5d   :  { %695 = vmatpush3.bf16.msra.mxu0 %v774_v39  ;;  %717 = vmatpush3.bf16.msra.mxu1 %v775_v40 }
  0x5e   :  { %696 = vmatprep.subr.bf16.mxu0 %v776_v41  ;;  %718 = vmatprep.subr.bf16.mxu1 %v777_v42  ;;  %v679_v42 = vld [vmem:[#allocation2] ss:$0 sm:$0xff] }
  0x61   :  { %697 = vmatpush3.bf16.msra.mxu0 %v778_v43  ;;  %719 = vmatpush3.bf16.msra.mxu1 %v779_v44 }
 0x117   :  { %v181_v56 = vpop.f32.mrb[0].mxu0  ;;  %v224_v57 = vpop.f32.mrb[0].mxu1 }
 0x118   :  { %v182_v58 = vadd.f32 %v181_v56, %v86_v52  ;;  %v225_v59 = vadd.f32 %v224_v57, %v94_v53  ;;  %v183_v60 = vpop.f32.mrb[1].mxu0  ;;  %v226_v61 = vpop.f32.mrb[1].mxu1 }
 0x119   :  { %v184_v62 = vadd.f32 %v183_v60, %v90_v54  ;;  %v227_v63 = vadd.f32 %v226_v61, %v98_v55  ;;  %v185_v0 = vpop.f32.mrb[2].mxu0  ;;  %v228_v1 = vpop.f32.mrb[2].mxu1 }
 0x11a   :  { %v235_v2 = vmax.f32 %v225_v59, 0.0  ;;  %v186_v3 = vadd.f32 %v185_v0, %v86_v52  ;;  %v229_v4 = vadd.f32 %v228_v1, %v94_v53  ;;  %v187_v5 = vpop.f32.mrb[3].mxu0  ;;  %v230_v6 = vpop.f32.mrb[3].mxu1  ;;  %v233_v10 = vmax.f32 %v182_v58, 0.0 }
 0x11b   :  { %v236_v7 = vmax.f32 %v227_v63, 0.0  ;;  %v188_v8 = vadd.f32 %v187_v5, %v90_v54  ;;  %v231_v9 = vadd.f32 %v230_v6, %v98_v55  ;;  %v234_v13 = vmax.f32 %v184_v62, 0.0 }
 0x11c   :  { %v237_v11 = vmax.f32 %v186_v3, 0.0  ;;  %v239_v12 = vmax.f32 %v229_v4, 0.0 }
 0x11d   :  { %v238_v14 = vmax.f32 %v188_v8, 0.0  ;;  %v240_v15 = vmax.f32 %v231_v9, 0.0 }
 0x11e   :  { %v241_v16 = vpack.c.bf16 %v237_v11, %v233_v10  ;;  %v243_v17 = vpack.c.bf16 %v239_v12, %v235_v2 }
 0x11f   :  { %v242_v18 = vpack.c.bf16 %v238_v14, %v234_v13  ;;  %v244_v19 = vpack.c.bf16 %v240_v15, %v236_v7 }
 0x121   :  { %540 = vmatprep.mubr.bf16.mxu0 %v242_v18  ;;  %581 = vmatprep.mubr.bf16.mxu1 %v244_v19 }
 0x122   :  { %541 = vmatmul.mubr.bf16.vlgmr.msra.gmra.mrb[4].mxu0 %v241_v16  ;;  %582 = vmatmul.mubr.bf16.vlgmr.msra.gmra.mrb[4].mxu1 %v243_v17 }
 0x1f5   :  { %v698_v20 = vpop.f32.mrb[4].mxu0  ;;  %v720_v21 = vpop.f32.mrb[4].mxu1 }
 0x1f6   :  { %v699_v23 = vpop.f32.mrb[5].mxu0  ;;  %v721_v24 = vpop.f32.mrb[5].mxu1 }
 0x1f7   :  { %v700_v25 = vadd.f32 %v699_v23, %v698_v20  ;;  %v722_v26 = vadd.f32 %v721_v24, %v720_v21  ;;  %v701_v27 = vpop.f32.mrb[6].mxu0  ;;  %v723_v28 = vpop.f32.mrb[6].mxu1 }
 0x1f8   :  { %v702_v29 = vpop.f32.mrb[7].mxu0  ;;  %v724_v30 = vpop.f32.mrb[7].mxu1 }
 0x1f9   :  { %v543_v31 = vadd.f32 %v700_v25, %v645_v22  ;;  %v703_v32 = vadd.f32 %v702_v29, %v701_v27  ;;  %v725_v33 = vadd.f32 %v724_v30, %v723_v28 }
 0x1fb   :  { %v546_v34 = vadd.f32 %v703_v32, %v645_v22  ;;  %v584_v35 = vadd.f32 %v722_v26, %v543_v31 }
 0x1fd   :  { %v587_v37 = vadd.f32 %v725_v33, %v546_v34  ;;  %v590_v38 = vmax.f32 %v584_v35, 0.0 }
 0x1ff   :  { %v591_v39 = vmax.f32 %v587_v37, 0.0  ;;  %v599_v40 = vmul.f32 %v678_v36, %v590_v38 }
 0x201   :  { %601 = vadd.xlane.f32.xlu0 %v599_v40  ;;  %v600_v41 = vmul.f32 %v678_v36, %v591_v39 }
 0x205   :  { %603 = vadd.xlane.f32.xlu0 %v600_v41 }
 0x28e   :  { %v602_v43 = vpop.xlane.xlu0 %601 }
 0x28f   :  { %v612_v44 = vadd.f32 %v679_v42, %v602_v43 }
 0x291   :  { %v680_v45 = vmul.f32 -1.442695, %v612_v44 }
 0x292   :  { %v604_v46 = vpop.xlane.xlu0 %603 }
 0x293   :  { %780 = vpow2.f32 %v680_v45  ;;  %v613_v47 = vadd.f32 %v679_v42, %v604_v46 }
 0x295   :  { %v681_v48 = vmul.f32 -1.442695, %v613_v47 }
 0x297   :  { %782 = vpow2.f32 %v681_v48 }
 0x29d   :  { %v781_v49 = vpop.eup %780 }
 0x29e   :  { %v620_v50 = vadd.f32 1.0, %v781_v49 }
 0x2a0   :  { %784 = vrcp.f32 %v620_v50 }
 0x2a1   :  { %v783_v51 = vpop.eup %782 }
 0x2a2   :  { %v621_v52 = vadd.f32 1.0, %v783_v51 }
 0x2a4   :  { %786 = vrcp.f32 %v621_v52 }
 0x2aa   :  { %v785_v53 = vpop.eup %784 }
 0x2ab   :  { %627 = vst.msk [vmem:[%s969_s7] sm:$0xff] %vm626_vm1, %v785_v53 }
 0x2ae   :  { %v787_v54 = vpop.eup %786 }
 0x2af   :  { %628 = vst.msk [vmem:[%s969_s7 + $0x8] sm:$0xff] %vm626_vm1, %v787_v54 }
 0x2b0   :  { %633 = vsyncpa [#allocation4], 1 }
 0x2b1   :  { %634 = vsyncpa [#allocation6], 1 }

</bundles_post_ra>
